<compile_context>
chip_gen: v5e
topology: v5e:2x2
jax: 0.10.0
libtpu: 0.0.40
codegen_flags: <defaults>
</compile_context>

<pallas_src>
import jax
import jax.numpy as jnp
from jax.experimental import pallas as pl
from jax.experimental.pallas import tpu as pltpu


# --------------------------------------------------------------------------
# chunk pickers
# --------------------------------------------------------------------------
def _pick_time_chunk(T, cap=32):
    """Largest CT <= cap dividing T with CT % 8 == 0 or CT == T, so the
    (B, CT, .) blocks keep a sublane-aligned second-minor dim."""
    for c in range(min(T, cap), 0, -1):
        if T % c == 0 and (c % 8 == 0 or c == T):
            return c
    return T  # fallback: whole sequence as one chunk (block == full dim is always legal)


def _pick_token_chunk(B, T, L, E, itemsize=4, budget_bytes=8 * 1024 * 1024, cap=64):
    """Largest tT <= cap with T % tT == 0, (tT % 8 == 0 or tT == T) whose
    double-buffered embedding block fits the per-call VMEM budget (sized so the
    v7x 32 MiB scoped / 64 MiB physical VMEM is respected, not just v5e/v6e)."""
    valid = [c for c in range(1, min(T, cap) + 1)
             if T % c == 0 and (c % 8 == 0 or c == T)]
    if not valid:
        return T
    fitting = [c for c in valid if 2 * B * c * L * E * itemsize <= budget_bytes]
    return max(fitting) if fitting else min(valid)


# --------------------------------------------------------------------------
# Kernel 1: fused token-embedding weighted-mean for BOTH sequences
#   out[s,b,t,:] = sum_l emb[s,b,t,l,:] * w[s,b,t,l]   (w already includes 1/mask)
# Grid is 2-D (sequence, time-tile), both parallel, so a 2-TensorCore chip (v7x)
# can split the work even when one time tile covers all of T.
# --------------------------------------------------------------------------
def token_reduce_kernel(emb_ref, w_ref, out_ref):
    # emb: (1, B, tT, L, E), w: (1, B, tT, L, 1) -> out: (1, B, tT, E)
    out_ref[...] = jnp.sum(emb_ref[...] * w_ref[...], axis=3)


def token_weighted_mean_pair(emb2, props2, mask):
    """emb2: (2, B, T, L, E), props2: (2, B, T, L), mask: (B, T)
       -> (x1_tok, x2_tok), each (B, T, E) float32."""
    _, B, T, L, E = emb2.shape
    # Guard against zero token counts (the PyTorch reference would produce inf/nan);
    # reciprocal-multiply instead of an E-wide per-element divide.
    safe_mask = jnp.where(mask == 0, 1.0, mask)
    w = (props2 * (1.0 / safe_mask)[None, :, :, None]).reshape(2, B, T, L, 1)

    tT = _pick_token_chunk(B, T, L, E)
    out = pl.pallas_call(
        token_reduce_kernel,
        out_shape=jax.ShapeDtypeStruct((2, B, T, E), jnp.float32),
        grid=(2, T // tT),
        in_specs=[
            pl.BlockSpec((1, B, tT, L, E), lambda s, i: (s, 0, i, 0, 0)),
            pl.BlockSpec((1, B, tT, L, 1), lambda s, i: (s, 0, i, 0, 0)),
        ],
        out_specs=pl.BlockSpec((1, B, tT, E), lambda s, i: (s, 0, i, 0)),
        compiler_params=pltpu.CompilerParams(
            dimension_semantics=("parallel", "parallel"),
            vmem_limit_bytes=32 * 1024 * 1024),
    )(emb2, w)
    return out[0], out[1]


# --------------------------------------------------------------------------
# Kernel 2: 2-layer GRU recurrence (batch-major, chunked over time)
#   * gi0 slab (layer-0 input projection + folded r/z biases) precomputed outside.
#   * per step: ONE critical-path matmul h1_t @ [Wih1^T | Whh0^T] -> [gi1_t | gh0_{t+1}],
#     plus the off-chain h2_{t-1} @ Whh1^T.
#   * inter-layer GRU dropout is identity at inference, so omitted.
# NOTE: remaining lane slices (at multiples of H) are tile-aligned and free whenever
# D_hid is a multiple of 128 (the production case); for the toy H=32 they are cheap
# masked selects.
# --------------------------------------------------------------------------
def gru2_recurrence_kernel(gi0rz_ref, gi0n_ref, wcomb_ref, whh1_ref,
                           bgi1_ref, bhn0_ref, bhn1_ref,
                           h2out_ref,
                           h1_ref, h2_ref, gh0_ref, h2stage_ref):
    c = pl.program_id(0)

    @pl.when(c == 0)
    def _():
        h1_ref[...] = jnp.zeros_like(h1_ref)
        h2_ref[...] = jnp.zeros_like(h2_ref)
        gh0_ref[...] = jnp.zeros_like(gh0_ref)   # h1_{-1} == 0  =>  gh0_0 == 0

    B, H = h1_ref.shape
    H2, H3 = 2 * H, 3 * H
    CT = gi0n_ref.shape[1]
    f32, bf16 = jnp.float32, jnp.bfloat16

    # Hoisted resident loads + a SINGLE broadcast of each bias (JAX does not CSE
    # broadcast_in_dim, so these must not sit inside the unrolled loop).
    w_comb = wcomb_ref[...]                       # (H, 6H) bf16 = [Wih1^T | Whh0^T]
    whh1_t = whh1_ref[...]                        # (H, 3H) bf16
    b_gi1 = jnp.broadcast_to(bgi1_ref[...], (B, H3))   # bih1 + bhh1_rz folded
    b_hn0 = jnp.broadcast_to(bhn0_ref[...], (B, H))    # bhh0_n
    b_hn1 = jnp.broadcast_to(bhn1_ref[...], (B, H))    # bhh1_n

    h1 = h1_ref[...]
    h2 = h2_ref[...]
    gh0 = gh0_ref[...]                            # primed h1_{t-1} @ Whh0^T

    # Static full unroll over the chunk: every slice index is a compile-time constant,
    # so no dynamic-sublane loads/stores land on the serial chain.
    # TODO(synk): for very long chunks (CT >> 32) switch to lax.fori_loop(unroll=4).
    for ct in range(CT):
        # ---- layer-0 cell: NO matmul on the critical path (gh0 already computed) ----
        gi_rz = gi0rz_ref[:, ct, :].astype(f32)   # includes bih0_rz + bhh0_rz
        gi_n = gi0n_ref[:, ct, :].astype(f32)     # includes bih0_n
        rz0 = jax.nn.sigmoid(gi_rz + gh0[:, :H2])
        n0 = jnp.tanh(gi_n + rz0[:, :H] * (gh0[:, H2:] + b_hn0))
        z0 = rz0[:, H:]
        h1 = (1.0 - z0) * n0 + z0 * h1

        # ---- merged matmul: [gi1_t | gh0_{t+1}] in one (B,H)@(H,6H) MXU launch ----
        combo = jnp.dot(h1.astype(bf16), w_comb, preferred_element_type=f32)
        gi1 = combo[:, :H3] + b_gi1
        gh0 = combo[:, H3:]                       # primes the next step / next chunk

        # ---- layer-1 hidden projection (off the h1->h1 critical chain) ----
        gh1 = jnp.dot(h2.astype(bf16), whh1_t, preferred_element_type=f32)
        rz1 = jax.nn.sigmoid(gi1[:, :H2] + gh1[:, :H2])
        n1 = jnp.tanh(gi1[:, H2:] + rz1[:, :H] * (gh1[:, H2:] + b_hn1))
        z1 = rz1[:, H:]
        h2 = (1.0 - z1) * n1 + z1 * h2

        h2stage_ref[:, ct, :] = h2                # static-index store into staging scratch

    # Carry state + primed gh0 across chunks; ONE block store of the chunk output.
    h1_ref[...] = h1
    h2_ref[...] = h2
    gh0_ref[...] = gh0
    h2out_ref[...] = h2stage_ref[...]


def gru2_fc(x, params):
    """x: (B, T, Din) float32 -> (B, T, output_frames) float32."""
    B, T, Din = x.shape
    H = params['whh0'].shape[1]
    F = params['wfc'].shape[0]
    H2, H3 = 2 * H, 3 * H
    f32, bf16 = jnp.float32, jnp.bfloat16

    # ---- one-time weight prep (glue) ----
    wih0_t = params['wih0'].T                                  # (Din, 3H)
    whh0_t = params['whh0'].T                                  # (H, 3H)
    wih1_t = params['wih1'].T                                  # (H, 3H)
    whh1_t = params['whh1'].T.astype(bf16)                     # (H, 3H)
    # merged per-step weight: one matmul on h1_t yields [gi1_t | gh0_{t+1}]
    w_comb = jnp.concatenate([wih1_t, whh0_t], axis=1).astype(bf16)   # (H, 6H)
    wfc_t = params['wfc'].T.astype(bf16)                       # (H, F)

    # ---- bias folding: r/z hidden biases move to the input side; only the n-gate
    #      hidden bias must stay inside r * (.) ----
    b0_rz = params['bih0'][:H2] + params['bhh0'][:H2]
    b0_n = params['bih0'][H2:]
    b_hn0 = params['bhh0'][H2:].reshape(1, H).astype(f32)
    b_gi1 = (params['bih1'] + jnp.concatenate(
        [params['bhh1'][:H2], jnp.zeros((H,), f32)])).reshape(1, H3).astype(f32)
    b_hn1 = params['bhh1'][H2:].reshape(1, H).astype(f32)

    # ---- (1) hoisted layer-0 input projection for ALL timesteps (batch-major,
    #      no activation transpose); slab pre-split into rz / n groups and stored bf16 ----
    g0 = jnp.dot(x.reshape(B * T, Din).astype(bf16), wih0_t.astype(bf16),
                 preferred_element_type=f32)                   # (B*T, 3H)
    gi0_rz = (g0[:, :H2] + b0_rz).reshape(B, T, H2).astype(bf16)
    gi0_n = (g0[:, H2:] + b0_n).reshape(B, T, H).astype(bf16)

    CT = _pick_time_chunk(T)
    resident = lambda: pl.BlockSpec(memory_space=pltpu.MemorySpace.VMEM)

    h2_all = pl.pallas_call(
        gru2_recurrence_kernel,
        out_shape=jax.ShapeDtypeStruct((B, T, H), f32),
        grid=(T // CT,),
        in_specs=[
            pl.BlockSpec((B, CT, H2), lambda c: (0, c, 0)),    # gi0_rz chunk
            pl.BlockSpec((B, CT, H), lambda c: (0, c, 0)),     # gi0_n chunk
            resident(),                                        # w_comb  (single VMEM copy)
            resident(),                                        # whh1_t
            resident(),                                        # b_gi1
            resident(),                                        # b_hn0
            resident(),                                        # b_hn1
        ],
        out_specs=pl.BlockSpec((B, CT, H), lambda c: (0, c, 0)),
        scratch_shapes=[
            pltpu.VMEM((B, H), f32),       # h1 carry
            pltpu.VMEM((B, H), f32),       # h2 carry
            pltpu.VMEM((B, H3), f32),      # primed gh0 carried across chunks
            pltpu.VMEM((B, CT, H), f32),   # per-chunk h2 staging buffer
        ],
        compiler_params=pltpu.CompilerParams(
            # serial carry in scratch: this axis must stay sequential — never "parallel"
            dimension_semantics=("arbitrary",),
            vmem_limit_bytes=32 * 1024 * 1024),
    )(gi0_rz, gi0_n, w_comb, whh1_t, b_gi1, b_hn0, b_hn1)

    # ---- (2) hoisted FC + sigmoid, batch-major throughout (no transpose) ----
    logits = jnp.dot(h2_all.reshape(B * T, H).astype(bf16), wfc_t,
                     preferred_element_type=f32).reshape(B, T, F) + params['bfc']
    return jax.nn.sigmoid(logits)


# --------------------------------------------------------------------------
# Parameter init (deterministic, synthetic) and full forward
# --------------------------------------------------------------------------
def init_params(key, vocab_size, D_a, D_v, D_hid, embed_size, output_frames,
                modal='all'):
    if modal == 'a':
        d_in = 2 * D_a
    elif modal == 'v':
        d_in = 2 * D_v
    elif modal == 'av':
        d_in = 2 * (D_a + D_v)
    elif modal == 'at':
        d_in = 2 * (D_a + embed_size)
    else:
        d_in = 2 * (D_a + D_v + embed_size)

    ks = jax.random.split(key, 11)
    s = 1.0 / float(D_hid) ** 0.5
    u = lambda k, shape: jax.random.uniform(k, shape, jnp.float32, -s, s)
    return {
        'embedding': jax.random.normal(ks[0], (vocab_size, embed_size), jnp.float32),
        'wih0': u(ks[1], (3 * D_hid, d_in)),
        'whh0': u(ks[2], (3 * D_hid, D_hid)),
        'bih0': u(ks[3], (3 * D_hid,)),
        'bhh0': u(ks[4], (3 * D_hid,)),
        'wih1': u(ks[5], (3 * D_hid, D_hid)),
        'whh1': u(ks[6], (3 * D_hid, D_hid)),
        'bih1': u(ks[7], (3 * D_hid,)),
        'bhh1': u(ks[8], (3 * D_hid,)),
        'wfc': u(ks[9], (output_frames, D_hid)),
        'bfc': u(ks[10], (output_frames,)),
    }


def mlp_general_forward(params, audio, video, token, props, mask, modal='all'):
    x1_audio, x2_audio = audio
    x1_video, x2_video = video
    x1_token, x2_token = token
    x1_props, x2_props = props

    # Embedding lookup is a data-dependent gather -> plain JAX glue (single gather for
    # both sequences); the weighted-sum reduction and GRU recurrence run in Pallas.
    # NOTE: jnp.take clamps out-of-range ids (torch.nn.Embedding would error).
    tokens = jnp.stack([x1_token, x2_token], axis=0)          # (2, B, T, L)
    emb2 = jnp.take(params['embedding'], tokens, axis=0)      # (2, B, T, L, E)
    props2 = jnp.stack([x1_props, x2_props], axis=0)          # (2, B, T, L)
    x1_tok, x2_tok = token_weighted_mean_pair(emb2, props2, mask)

    if modal == 'a':
        x1, x2 = x1_audio, x2_audio
    elif modal == 'v':
        x1, x2 = x1_video, x2_video
    elif modal == 'av':
        x1 = jnp.concatenate([x1_audio, x1_video], axis=-1)
        x2 = jnp.concatenate([x2_audio, x2_video], axis=-1)
    elif modal == 'at':
        x1 = jnp.concatenate([x1_audio, x1_tok], axis=-1)
        x2 = jnp.concatenate([x2_audio, x2_tok], axis=-1)
    else:
        x1 = jnp.concatenate([x1_audio, x1_video, x1_tok], axis=-1)
        x2 = jnp.concatenate([x2_audio, x2_video, x2_tok], axis=-1)

    x = jnp.concatenate([x1, x2], axis=-1)                    # (B, T, 2*(D_a+D_v+E))
    return gru2_fc(x, params)                                 # (B, T, output_frames)


if __name__ == "__main__":
    B, T, L = 2, 8, 6
    D_a, D_v, E, D_hid, OUT_F = 12, 20, 128, 32, 15
    vocab = 50

    key = jax.random.PRNGKey(0)
    kp, k1, k2, k3, k4, k5, k6, k7, k8 = jax.random.split(key, 9)
    params = init_params(kp, vocab, D_a, D_v, D_hid, E, OUT_F, modal='all')

    x1_audio = jax.random.normal(k1, (B, T, D_a), jnp.float32)
    x2_audio = jax.random.normal(k2, (B, T, D_a), jnp.float32)
    x1_video = jax.random.normal(k3, (B, T, D_v), jnp.float32)
    x2_video = jax.random.normal(k4, (B, T, D_v), jnp.float32)
    x1_token = jax.random.randint(k5, (B, T, L), 0, vocab)
    x2_token = jax.random.randint(k6, (B, T, L), 0, vocab)
    x1_props = jax.random.uniform(k7, (B, T, L), jnp.float32)
    x2_props = jax.random.uniform(k8, (B, T, L), jnp.float32)
    mask = jnp.full((B, T), float(L), jnp.float32)            # token counts (non-zero)

    out = mlp_general_forward(
        params,
        audio=(x1_audio, x2_audio),
        video=(x1_video, x2_video),
        token=(x1_token, x2_token),
        props=(x1_props, x2_props),
        mask=mask,
        modal='all',
    )
    out = jax.block_until_ready(out)
    assert out.shape == (B, T, OUT_F) and out.dtype == jnp.float32
    assert bool(jnp.all(jnp.isfinite(out)))
    print("KERNEL_OK")
</pallas_src>

<mosaic_0001>
module attributes {stable_mosaic.version = 11 : i64} {
  func.func @token_reduce_kernel(%arg0: i32, %arg1: i32, %arg2: memref<1x2x8x6x128xf32, #tpu.memory_space<vmem>>, %arg3: memref<1x2x8x6x1xf32, #tpu.memory_space<vmem>>, %arg4: memref<1x2x8x128xf32, #tpu.memory_space<vmem>>) attributes {dimension_semantics = [#tpu.dimension_semantics<parallel>, #tpu.dimension_semantics<parallel>], iteration_bounds = array<i64: 2, 1>, scalar_prefetch = 0 : i64, scratch_operands = 0 : i64, tpu.core_type = #tpu.core_type<tc>, window_params = [{transform_indices = @transform_0, window_bounds = array<i64: 1, 2, 8, 6, 128>}, {transform_indices = @transform_1, window_bounds = array<i64: 1, 2, 8, 6, 1>}, {transform_indices = @transform_2, window_bounds = array<i64: 1, 2, 8, 128>}]} {
    %c0 = arith.constant 0 : index
    %c0_0 = arith.constant 0 : index
    %c0_1 = arith.constant 0 : index
    %c0_2 = arith.constant 0 : index
    %c0_3 = arith.constant 0 : index
    %0 = vector.load %arg2[%c0, %c0_0, %c0_1, %c0_2, %c0_3] : memref<1x2x8x6x128xf32, #tpu.memory_space<vmem>>, vector<1x2x8x6x128xf32>
    %c0_4 = arith.constant 0 : index
    %c0_5 = arith.constant 0 : index
    %c0_6 = arith.constant 0 : index
    %c0_7 = arith.constant 0 : index
    %c0_8 = arith.constant 0 : index
    %1 = vector.load %arg3[%c0_4, %c0_5, %c0_6, %c0_7, %c0_8] : memref<1x2x8x6x1xf32, #tpu.memory_space<vmem>>, vector<1x2x8x6x1xf32>
    %2 = vector.broadcast %1 : vector<1x2x8x6x1xf32> to vector<1x2x8x6x128xf32>
    %3 = arith.mulf %0, %2 : vector<1x2x8x6x128xf32>
    %cst = arith.constant dense<0.000000e+00> : vector<1x2x8x128xf32>
    %4 = vector.multi_reduction <add>, %3, %cst [3] : vector<1x2x8x6x128xf32> to vector<1x2x8x128xf32>
    %c0_9 = arith.constant 0 : index
    %c0_10 = arith.constant 0 : index
    %c0_11 = arith.constant 0 : index
    %c0_12 = arith.constant 0 : index
    %5 = vector.load %arg4[%c0_9, %c0_10, %c0_11, %c0_12] : memref<1x2x8x128xf32, #tpu.memory_space<vmem>>, vector<1x2x8x128xf32>
    tpu.vector_store %arg4[%c0_9, %c0_10, %c0_11, %c0_12], %4 {strides = array<i32>} : memref<1x2x8x128xf32, #tpu.memory_space<vmem>>, vector<1x2x8x128xf32>,
    return
  }
  func.func @transform_0(%arg0: i32, %arg1: i32) -> (i32, i32, i32, i32, i32) {
    %c0_i32 = arith.constant 0 : i32
    %c0_i32_0 = arith.constant 0 : i32
    %c0_i32_1 = arith.constant 0 : i32
    %c0_i32_2 = arith.constant 0 : i32
    return %arg0, %c0_i32, %arg1, %c0_i32_0, %c0_i32_1 : i32, i32, i32, i32, i32
  }
  func.func @transform_1(%arg0: i32, %arg1: i32) -> (i32, i32, i32, i32, i32) {
    %c0_i32 = arith.constant 0 : i32
    %c0_i32_0 = arith.constant 0 : i32
    %c0_i32_1 = arith.constant 0 : i32
    %c0_i32_2 = arith.constant 0 : i32
    return %arg0, %c0_i32, %arg1, %c0_i32_0, %c0_i32_1 : i32, i32, i32, i32, i32
  }
  func.func @transform_2(%arg0: i32, %arg1: i32) -> (i32, i32, i32, i32) {
    %c0_i32 = arith.constant 0 : i32
    %c0_i32_0 = arith.constant 0 : i32
    %c0_i32_1 = arith.constant 0 : i32
    return %arg0, %c0_i32, %arg1, %c0_i32_0 : i32, i32, i32, i32
  }
}

</mosaic_0001>

<bundles_post_ra>
// kernel: tpu_custom_call.1
= control target key start
LH: loop header
LB: loop body
LE: loop exit
PB: predicated region body
PF: predicated region fallthrough
CT: control target
= control target key end

     0   :  { %7 = vsyncpa [#allocation3], 0  ;;  %s961_s0 = inlined_call_operand.vmem [shape: f32[2,2,8,6,128], index: 0, kind: input, shape index: {}]   ;;  %s962_s1 = inlined_call_operand.vmem [shape: f32[2,2,8,6,1], index: 1, kind: input, shape index: {}]   ;;  %s963_s2 = inlined_call_operand.hbm [shape: f32[2,2,8,128], index: 2, kind: output, shape index: {}]  }
   0x1   :  { %9 = vsyncpa [#allocation3 + $0x1], 0  ;;  %s780_s9 = smov 0   ;;  %s782_s10 = smov 0  }
   0x2   :  { %s784_s11 = smov 0   ;;  %s786_s12 = smov 0  }
   0x3   :  { %s788_s13 = smov 0   ;;  %s790_s14 = smov 0  }
   0x4 LB: > { %s603_s15 = sadd.s32 4294967295, %s760_s14   ;;  %s604_s16 = sadd.s32 4294967294, %s760_s14   ;;  %s760_s14 = sphi %s790_s14, %s15_s14   ;;  %s756_s13 = sphi %s788_s13, %s970_s13   ;;  %s752_s12 = sphi %s786_s12, %s969_s12   ;;  %s748_s11 = sphi %s784_s11, %s968_s11   ;;  %s744_s10 = sphi %s782_s10, %s967_s10   ;;  %s740_s9 = sphi %s780_s9, %s966_s9  }
   0x5   : > { %s27_s17 = sadd.s32 1, %s756_s13  ;;  %s92_s18 = sadd.s32 1, %s748_s11 }
   0x6   : > { %p29_p0 = scmp.ge.s32.totalorder %s27_s17, 2  ;;  %p102_p1 = scmp.ne.s32.totalorder %s748_s11, %s744_s10 }
   0x7   : > { %p103_p2 = scmp.eq.s32.totalorder %s603_s15, 1  ;;  %p108_p3 = scmp.ne.s32.totalorder %s744_s10, %s740_s9 }
   0x8   : > { %s972_s17 = smov (%p29_p0, %s27_s17), 0  ;;  %p109_p5 = scmp.eq.s32.totalorder %s604_s16, 1 }
   0x9   : > { %p820_p4 = por %p103_p2, %p102_p1  ;;  %s87_s20 = ssub.s32 %s756_s13, %s972_s17 }
   0xa   : > { %p607_p6 = scmp.ge.s32.totalorder %s760_s14, 1  ;;  %p90_p7 = scmp.eq.s32.totalorder %s87_s20, 0 }
   0xb   : > { %p827_p8 = por %p109_p5, %p108_p3  ;;  %p153_p9 = scmp.lt.s32.totalorder %s760_s14, 3 }
   0xc   : > { %s833_s22 = scalar_select %p90_p7, %s748_s11, %s92_s18  }
   0xd   : > { %p154_p10 = pnand %p607_p6, %p153_p9 }
   0xe   : > { %p189_p11 = scmp.lt.s32.totalorder (!%p154_p10), %s752_s12, 1  ;;  %s185_s3 = sand.u32 (!%p154_p10), 1, %s744_s10  }
   0xf   : > { %157 = sbr.rel (%p154_p10) target bundleno = 201 (0xc9), region = 28  ;;  %s608_s4 = sshll.u32 (!%p154_p10), %s185_s3, 4 }
  0x10   : > { %s620_s5 = sshll.u32 (!%p154_p10), %s752_s12, 4  ;;  %s491_s18 = scalar_lea.sflag (!%p154_p10), [#allocation3], %s185_s3 }
  0x11   : > { %s503_s8 = scalar_lea.hbm (!%p154_p10), %s963_s2, %s620_s5  ;;  %s702_s26 = scalar_lea.hbm (!%p154_p10), %s963_s2, 32 }
  0x12   : > { %s506_s16 = sshll.u32 (!%p154_p10), %s503_s8, 4  ;;  %s507_s16 = int_to_ptr.hbm [resolvable:$true] %s506_s16 }
  0x13   : > { %s696_s20 = sshra.s32 (!%p154_p10), %s507_s16, 4  ;;  %s697_s20 = int_to_ptr.hbm [resolvable:$true] %s696_s20 }
  0x14   : > { %v762_v0 = vmov 0   ;;  %s837_s23 = scalar_select %p189_p11, %s752_s12, 1  ;;  %vm336_vm0 = vcmask 1045504   ;;  %vm465_vm1 = vcmask 1041409   ;;  %vm467_vm2 = vcmask 1042434  }
  0x15   : > { %681 = vset.pattern.permute.xlu2 %v762_v0  ;;  %680 = vset.pattern.permute.xlu1 %v762_v0  ;;  %vm469_vm3 = vcmask 1043459   ;;  %vm471_vm4 = vcmask 1044484   ;;  %vm473_vm5 = vcmask 1045509   ;;  %vm475_vm6 = vcmask 1046534   ;;  %s187_s12 = scalar_lea.vmem [#allocation2], %s608_s4  ;;  %p703_p1 = scmp.lt.s32.totalorder %s697_s20, %s963_s2 }
  0x16   : > { %679 = vset.pattern.permute.xlu0 %v762_v0  ;;  %s618_s24 = sshll.u32 %s837_s23, 7  ;;  %vm477_vm7 = vcmask 1047559   ;;  %s504_s15 = sshll.u32 %s187_s12, 4  ;;  %s505_s15 = int_to_ptr.vmem [resolvable:$true] %s504_s15 }
  0x17   : > { %s845_s27 = scalar_lea.vmem %s962_s1, %s618_s24  ;;  %s868_s30 = scalar_lea.vmem %s961_s0, %s618_s24 }
  0x18   : > { %v228_v1 = vld [vmem:[%s845_s27 + $0x20] sm:$0x3f]  ;;  %v226_v2 = vld [vmem:[%s845_s27 + $0x10] sm:$0x3f]  ;;  %v229_v4 = vld [vmem:[%s845_s27 + $0x28] sm:$0x3f] }
  0x19   : > { %v224_v3 = vld [vmem:[%s845_s27] sm:$0x3f]  ;;  %262 = vperm.xlu2 %681, %v228_v1   ;;  %252 = vperm.xlu1 %680, %v226_v2   ;;  %v227_v5 = vld [vmem:[%s845_s27 + $0x18] sm:$0x3f]  ;;  %v225_v6 = vld [vmem:[%s845_s27 + $0x8] sm:$0x3f] }
  0x1a   : > { %242 = vperm.xlu0 %679, %v224_v3   ;;  %v234_v7 = vld [vmem:[%s845_s27 + $0x50] sm:$0x3f]  ;;  %v233_v8 = vld [vmem:[%s845_s27 + $0x48] sm:$0x3f]  ;;  %v232_v9 = vld [vmem:[%s845_s27 + $0x40] sm:$0x3f] }
  0x1b   : > { %v237_v10 = vld [vmem:[%s845_s27 + $0x68] sm:$0x3f]  ;;  %v236_v11 = vld [vmem:[%s845_s27 + $0x60] sm:$0x3f]  ;;  %v235_v12 = vld [vmem:[%s845_s27 + $0x58] sm:$0x3f] }
  0x1c   : > { %v231_v13 = vld [vmem:[%s845_s27 + $0x38] sm:$0x3f]  ;;  %v238_v14 = vld [vmem:[%s845_s27 + $0x70] sm:$0x3f]  ;;  %v208_v22 = vld [vmem:[%s868_s30] sm:$0x3f] }
  0x1d   : > { %v230_v15 = vld [vmem:[%s845_s27 + $0x30] sm:$0x3f]  ;;  %v239_v16 = vld [vmem:[%s845_s27 + $0x78] sm:$0x3f]  ;;  %v212_v23 = vld [vmem:[%s868_s30 + $0x20] sm:$0x3f] }
  0x1e   : > { %v210_v24 = vld [vmem:[%s868_s30 + $0x10] sm:$0x3f]  ;;  %v209_v29 = vld [vmem:[%s868_s30 + $0x8] sm:$0x3f]  ;;  %v211_v32 = vld [vmem:[%s868_s30 + $0x18] sm:$0x3f] }
  0x1f   : > { %v213_v40 = vld [vmem:[%s868_s30 + $0x28] sm:$0x3f]  ;;  %v216_v47 = vld [vmem:[%s868_s30 + $0x40] sm:$0x3f]  ;;  %v218_v49 = vld [vmem:[%s868_s30 + $0x50] sm:$0x3f] }
  0x20   : > { %v217_v43 = vld [vmem:[%s868_s30 + $0x48] sm:$0x3f]  ;;  %v215_v53 = vld [vmem:[%s868_s30 + $0x38] sm:$0x3f]  ;;  %s698_s23 = scalar_lea.hbm %s697_s20, 16 }
  0x21   : > { %267 = vperm.xlu2 %681, %v229_v4   ;;  %257 = vperm.xlu1 %680, %v227_v5   ;;  %v221_v5 = vld [vmem:[%s868_s30 + $0x68] sm:$0x3f]  ;;  %p699_p12 = scmp.ne.s32.totalorder %s697_s20, %s698_s23  ;;  %p704_p2 = scmp.lt.s32.totalorder %s702_s26, %s698_s23 }
  0x22   : > { %247 = vperm.xlu0 %679, %v225_v6  }
  0x23   : > { %p700_p13 = pnand %p699_p12, %p820_p4  ;;  %p705_p3 = por %p704_p2, %p703_p1 }
  0x25   : > { %p701_p0 = pneg %p700_p13 }
  0x27   : > { %p706_p5 = pnand %p705_p3, %p701_p0 }
  0x29   : > { %292 = vperm.xlu2 %681, %v234_v7   ;;  %287 = vperm.xlu1 %680, %v233_v8  }
  0x2a   : > { %282 = vperm.xlu0 %679, %v232_v9  }
  0x31   : > { %307 = vperm.xlu2 %681, %v237_v10   ;;  %302 = vperm.xlu1 %680, %v236_v11   ;;  %v220_v10 = vld [vmem:[%s868_s30 + $0x60] sm:$0x3f] }
  0x32   : > { %297 = vperm.xlu0 %679, %v235_v12  }
  0x39   : > { %277 = vperm.xlu2 %681, %v231_v13   ;;  %312 = vperm.xlu1 %680, %v238_v14   ;;  %v219_v14 = vld [vmem:[%s868_s30 + $0x58] sm:$0x3f] }
  0x3a   : > { %272 = vperm.xlu0 %679, %v230_v15  }
  0x42   : > { %317 = vperm.xlu0 %679, %v239_v16  }
  0x73   : > { %v263_v17 = vpop.permute.xlu2 %262 }
  0x74   : > { %v324_v26 = vmul.f32 %v263_v17, %v212_v23 }
  0x76   : > { %v365_v34 = vsel %vm336_vm0, %v324_v26, 0.0 }
  0x77   : > { %v366_v39 = vrot.slane %v365_v34, 4 }
  0x79   : > { %v367_v51 = vadd.f32 %v366_v39, %v365_v34 }
  0x7b   : > { %v268_v18 = vpop.permute.xlu2 %267  ;;  %v368_v4 = vrot.slane %v367_v51, 2 }
  0x7c   : > { %v325_v48 = vmul.f32 %v268_v18, %v213_v40 }
  0x7e   : > { %v372_v0 = vsel %vm336_vm0, %v325_v48, 0.0  ;;  %v214_v48 = vld [vmem:[%s868_s30 + $0x30] sm:$0x3f] }
  0x7f   : > { %v373_v11 = vrot.slane %v372_v0, 4 }
  0x83   : > { %v293_v19 = vpop.permute.xlu2 %292 }
  0x84   : > { %v330_v60 = vmul.f32 %v293_v19, %v218_v49  ;;  %v893_v19 = vadd.f32 %v368_v4, %v367_v51 }
  0x86   : > { %v407_v12 = vsel %vm336_vm0, %v330_v60, 0.0 }
  0x8b   : > { %v253_v20 = vpop.permute.xlu1 %252  ;;  %v308_v27 = vpop.permute.xlu2 %307 }
  0x8c   : > { %v243_v21 = vpop.permute.xlu0 %242  ;;  %v322_v28 = vmul.f32 %v253_v20, %v210_v24  ;;  %v333_v15 = vmul.f32 %v308_v27, %v221_v5  ;;  %v408_v24 = vrot.slane %v407_v12, 4 }
  0x8d   : > { %v320_v25 = vmul.f32 %v243_v21, %v208_v22 }
  0x8e   : > { %v351_v36 = vsel %vm336_vm0, %v322_v28, 0.0  ;;  %v409_v40 = vadd.f32 %v408_v24, %v407_v12 }
  0x8f   : > { %v337_v30 = vsel %vm336_vm0, %v320_v25, 0.0  ;;  %v352_v42 = vrot.slane %v351_v36, 4 }
  0x90   : > { %v338_v37 = vrot.slane %v337_v30, 4 }
  0x91   : > { %v353_v57 = vadd.f32 %v352_v42, %v351_v36  ;;  %v370_v36 = vrot.slane %v893_v19, 1 }
  0x92   : > { %v339_v44 = vadd.f32 %v338_v37, %v337_v30 }
  0x93   : > { %v258_v31 = vpop.permute.xlu1 %257  ;;  %v278_v52 = vpop.permute.xlu2 %277  ;;  %v354_v8 = vrot.slane %v353_v57, 2 }
  0x94   : > { %v248_v33 = vpop.permute.xlu0 %247  ;;  %v323_v38 = vmul.f32 %v258_v31, %v211_v32  ;;  %v340_v61 = vrot.slane %v339_v44, 2  ;;  %v327_v1 = vmul.f32 %v278_v52, %v215_v53  ;;  %v428_v32 = vsel %vm336_vm0, %v333_v15, 0.0 }
  0x95   : > { %v321_v35 = vmul.f32 %v248_v33, %v209_v29  ;;  %v355_v25 = vadd.f32 %v354_v8, %v353_v57  ;;  %v374_v29 = vadd.f32 %v373_v11, %v372_v0 }
  0x96   : > { %v358_v45 = vsel %vm336_vm0, %v323_v38, 0.0  ;;  %v341_v13 = vadd.f32 %v340_v61, %v339_v44  ;;  %v386_v16 = vsel %vm336_vm0, %v327_v1, 0.0  ;;  %v429_v44 = vrot.slane %v428_v32, 4 }
  0x97   : > { %v344_v41 = vsel %vm336_vm0, %v321_v35, 0.0  ;;  %v359_v58 = vrot.slane %v358_v45, 4  ;;  %v387_v31 = vrot.slane %v386_v16, 4  ;;  %v375_v49 = vrot.slane %v374_v29, 2 }
  0x98   : > { %v345_v46 = vrot.slane %v344_v41, 4  ;;  %v342_v30 = vrot.slane %v341_v13, 1 }
  0x99   : > { %v360_v9 = vadd.f32 %v359_v58, %v358_v45  ;;  %v410_v58 = vrot.slane %v409_v40, 2 }
  0x9a   : > { %v346_v54 = vadd.f32 %v345_v46, %v344_v41  ;;  %v356_v41 = vrot.slane %v355_v25, 1  ;;  %v343_v45 = vadd.f32 %v342_v30, %v341_v13  ;;  %v388_v46 = vadd.f32 %v387_v31, %v386_v16  ;;  %v223_v16 = vld [vmem:[%s868_s30 + $0x78] sm:$0x3f] }
  0x9b   : > { %v288_v50 = vpop.permute.xlu1 %287  ;;  %v361_v26 = vrot.slane %v360_v9, 2 }
  0x9c   : > { %v329_v55 = vmul.f32 %v288_v50, %v217_v43  ;;  %v283_v56 = vpop.permute.xlu0 %282  ;;  %v347_v62 = vrot.slane %v346_v54, 2  ;;  %v222_v43 = vld [vmem:[%s868_s30 + $0x70] sm:$0x3f] }
  0x9d   : > { %v328_v59 = vmul.f32 %v283_v56, %v216_v47  ;;  %v362_v42 = vadd.f32 %v361_v26, %v360_v9  ;;  %v376_v9 = vadd.f32 %v375_v49, %v374_v29  ;;  %v371_v26 = vadd.f32 %v370_v36, %v893_v19 }
  0x9e   : > { %v400_v63 = vsel %vm336_vm0, %v329_v55, 0.0  ;;  %v348_v6 = vadd.f32 %v347_v62, %v346_v54  ;;  %v430_v62 = vadd.f32 %v429_v44, %v428_v32 }
  0x9f   : > { %v401_v2 = vrot.slane %v400_v63, 4  ;;  %v393_v3 = vsel %vm336_vm0, %v328_v59, 0.0  ;;  %v357_v59 = vadd.f32 %v356_v41, %v355_v25  ;;  %v363_v60 = vrot.slane %v362_v42, 1 }
  0xa0   : > { %v394_v7 = vrot.slane %v393_v3, 4  ;;  %v349_v20 = vrot.slane %v348_v6, 1  ;;  %v431_v13 = vrot.slane %v430_v62, 2 }
  0xa1   : > { %v402_v17 = vadd.f32 %v401_v2, %v400_v63  ;;  %v389_v63 = vrot.slane %v388_v46, 2  ;;  %v364_v11 = vadd.f32 %v363_v60, %v362_v42 }
  0xa2   : > { %v395_v21 = vadd.f32 %v394_v7, %v393_v3  ;;  %v350_v37 = vadd.f32 %v349_v20, %v348_v6  ;;  %v432_v31 = vadd.f32 %v431_v13, %v430_v62 }
  0xa3   : > { %v303_v18 = vpop.permute.xlu1 %302  ;;  %v403_v33 = vrot.slane %v402_v17, 2 }
  0xa4   : > { %v332_v22 = vmul.f32 %v303_v18, %v220_v10  ;;  %v298_v23 = vpop.permute.xlu0 %297  ;;  %v396_v38 = vrot.slane %v395_v21, 2  ;;  %v466_v53 = vsel %vm465_vm1, %v350_v37, %v343_v45  ;;  %v411_v10 = vadd.f32 %v410_v58, %v409_v40 }
  0xa5   : > { %v331_v28 = vmul.f32 %v298_v23, %v219_v14  ;;  %v404_v50 = vadd.f32 %v403_v33, %v402_v17  ;;  %v468_v1 = vsel %vm467_vm2, %v357_v59, %v466_v53  ;;  %v390_v14 = vadd.f32 %v389_v63, %v388_v46 }
  0xa6   : > { %v421_v27 = vsel %vm336_vm0, %v332_v22, 0.0  ;;  %v397_v54 = vadd.f32 %v396_v38, %v395_v21  ;;  %v470_v18 = vsel %vm469_vm3, %v364_v11, %v468_v1  ;;  %v412_v29 = vrot.slane %v411_v10, 1 }
  0xa7   : > { %v422_v34 = vrot.slane %v421_v27, 4  ;;  %v414_v35 = vsel %vm336_vm0, %v331_v28, 0.0  ;;  %v405_v5 = vrot.slane %v404_v50, 1  ;;  %v377_v28 = vrot.slane %v376_v9, 1 }
  0xa8   : > { %v415_v39 = vrot.slane %v414_v35, 4  ;;  %v398_v6 = vrot.slane %v397_v54, 1  ;;  %v413_v41 = vadd.f32 %v412_v29, %v411_v10  ;;  %v433_v49 = vrot.slane %v432_v31, 1 }
  0xa9   : > { %v423_v51 = vadd.f32 %v422_v34, %v421_v27  ;;  %v406_v21 = vadd.f32 %v405_v5, %v404_v50  ;;  %v391_v27 = vrot.slane %v390_v14, 1  ;;  %v378_v40 = vadd.f32 %v377_v28, %v376_v9 }
  0xaa   : > { %v416_v47 = vadd.f32 %v415_v39, %v414_v35  ;;  %v399_v22 = vadd.f32 %v398_v6, %v397_v54  ;;  %v472_v35 = vsel %vm471_vm4, %v371_v26, %v470_v18 }
  0xab   : > { %v313_v52 = vpop.permute.xlu1 %312  ;;  %v424_v2 = vrot.slane %v423_v51, 2  ;;  %v392_v42 = vadd.f32 %v391_v27, %v390_v14 }
  0xac   : > { %v417_v55 = vrot.slane %v416_v47, 2  ;;  %v334_v56 = vmul.f32 %v313_v52, %v222_v43  ;;  %v273_v57 = vpop.permute.xlu0 %272  ;;  %v479_v38 = vsel %vm465_vm1, %v406_v21, %v399_v22 }
  0xad   : > { %v326_v61 = vmul.f32 %v273_v57, %v214_v48  ;;  %v425_v17 = vadd.f32 %v424_v2, %v423_v51  ;;  %v480_v46 = vsel %vm467_vm2, %v413_v41, %v479_v38  ;;  %v474_v48 = vsel %vm473_vm5, %v378_v40, %v472_v35 }
  0xae   : > { %v435_v0 = vsel %vm336_vm0, %v334_v56, 0.0  ;;  %v418_v7 = vadd.f32 %v417_v55, %v416_v47  ;;  %v434_v57 = vadd.f32 %v433_v49, %v432_v31 }
  0xaf   : > { %v436_v3 = vrot.slane %v435_v0, 4  ;;  %v379_v4 = vsel %vm336_vm0, %v326_v61, 0.0  ;;  %v426_v33 = vrot.slane %v425_v17, 1 }
  0xb0   : > { %v380_v8 = vrot.slane %v379_v4, 4  ;;  %v419_v23 = vrot.slane %v418_v7, 1 }
  0xb1   : > { %v437_v12 = vadd.f32 %v436_v3, %v435_v0  ;;  %v427_v45 = vadd.f32 %v426_v33, %v425_v17 }
  0xb2   : > { %v381_v15 = vadd.f32 %v380_v8, %v379_v4  ;;  %v420_v39 = vadd.f32 %v419_v23, %v418_v7 }
  0xb3   : > { %v438_v20 = vrot.slane %v437_v12, 2 }
  0xb4   : > { %v382_v24 = vrot.slane %v381_v15, 2  ;;  %v318_v25 = vpop.permute.xlu0 %317  ;;  %v481_v50 = vsel %vm469_vm3, %v420_v39, %v480_v46 }
  0xb5   : > { %v335_v30 = vmul.f32 %v318_v25, %v223_v16  ;;  %v439_v34 = vadd.f32 %v438_v20, %v437_v12  ;;  %v482_v55 = vsel %vm471_vm4, %v427_v45, %v481_v50 }
  0xb6   : > { %v383_v32 = vadd.f32 %v382_v24, %v381_v15  ;;  %v483_v59 = vsel %vm473_vm5, %v434_v57, %v482_v55 }
  0xb7   : > { %v442_v37 = vsel %vm336_vm0, %v335_v30, 0.0  ;;  %v440_v47 = vrot.slane %v439_v34, 1 }
  0xb8   : > { %v384_v19 = vrot.slane %v383_v32, 1  ;;  %v443_v36 = vrot.slane %v442_v37, 4 }
  0xb9   : > { %v441_v56 = vadd.f32 %v440_v47, %v439_v34 }
  0xba   : > { %v385_v43 = vadd.f32 %v384_v19, %v383_v32  ;;  %v444_v44 = vadd.f32 %v443_v36, %v442_v37 }
  0xbb   : > { %v484_v61 = vsel %vm475_vm6, %v441_v56, %v483_v59 }
  0xbc   : > { %v476_v51 = vsel %vm475_vm6, %v385_v43, %v474_v48  ;;  %v445_v52 = vrot.slane %v444_v44, 2 }
  0xbd   : > { %v478_v53 = vsel %vm477_vm7, %v392_v42, %v476_v51 }
  0xbe   : > { %v446_v54 = vadd.f32 %v445_v52, %v444_v44  ;;  %488 = vst [vmem:[%s187_s12] sm:$0xff] %v478_v53 }
  0xc0   : > { %v447_v58 = vrot.slane %v446_v54, 1 }
  0xc2   : > { %v448_v60 = vadd.f32 %v447_v58, %v446_v54 }
  0xc4   : > { %v485_v62 = vsel %vm477_vm7, %v448_v60, %v484_v61 }
  0xc5   : > { %489 = vst [vmem:[%s187_s12 + $0x8] sm:$0xff] %v485_v62 }
  0xc6   : > { %709 = shalt.err (!%p706_p5)
}
  0xc7   : > { %s763_s29 = smov 128   ;;  %s764_s30 = smov 8  }
  0xc8   : > { %621 = dma.vmem_to_hbm [thread:$0]  (%p820_p4), %s505_s15, 256, %s507_s16, %s491_s18, %s763_s29, %s763_s29, %s764_s30  }
  0xc9 PF: > { %p627_p6 = scmp.ge.s32.totalorder %s760_s14, 2  ;;  %s521_s3 = sand.u32 1, %s740_s9  }
  0xca   : > { %s522_s4 = scalar_lea.sflag [#allocation3], %s521_s3 }
  0xcb   : > { %p624_p7 = pnand %p627_p6, %p827_p8 }
  0xcd   : > { %p625_p9 = pneg %p624_p7 }
  0xcf   : > { %735 = dma.done.wait (%p625_p9), %s522_s4, 256  }
  0xd0   : > { %737 = vsyncadd (%p625_p9), %s522_s4, 4294967040  ;;  %s15_s14 = sadd.s32 1, %s760_s14   ;;  %s966_s9 = smov %s744_s10 }
  0xd1   : > { %p12_p10 = scmp.ge.s32.totalorder %s15_s14, 4   ;;  %s967_s10 = smov %s748_s11 }
  0xd2   : > { %s968_s11 = smov %s833_s22  ;;  %s969_s12 = smov %s756_s13 }
  0xd3   : > { %s970_s13 = smov %s972_s17  ;;  %14 = sbr.rel (!%p12_p10) target bundleno = 4 (0x4), region = 66 }
  0xd8   :  { %528 = vsyncpa [#allocation3], 1 }
  0xd9   :  { %530 = vsyncpa [#allocation3 + $0x1], 1 }

</bundles_post_ra>
